<compile_context>
chip_gen: v7x
topology: tpu7x:2x2x1
jax: 0.10.0
libtpu: 0.0.40
codegen_flags: <defaults>
</compile_context>

<pallas_src>
import jax
import jax.numpy as jnp
from jax.experimental import pallas as pl
from jax.experimental.pallas import tpu as pltpu

# CIFAR-10 normalization constants (from the module).
_CIFAR_MEAN = jnp.array([0.4914, 0.4822, 0.4465], dtype=jnp.float32)
_CIFAR_STD = jnp.array([0.2023, 0.1994, 0.2010], dtype=jnp.float32)

_LANE = 128
_SUBLANE = 8
_TARGET_BLOCK_BYTES = 2 * 1024 * 1024  # ~2 MiB per x block (mem-bound sweet spot)


def _renorm_kernel(scale_ref, bias_ref, x_ref, o_ref):
    # scale_ref / bias_ref: (1, tc) rows, sublane-broadcast over the batch tile.
    # x_ref / o_ref:        (tn, tc) blocks of the (N, C*H*W) view.
    o_ref[...] = x_ref[...] * scale_ref[...] + bias_ref[...]


def _choose_tiles(n, chw, itemsize):
    """Pick (tn, tc) respecting the (8, 128) block rules and a ~2 MiB block budget."""
    if chw % _LANE == 0:
        tc = min(chw, 4096)  # both are multiples of 128 -> tc is a multiple of 128
    else:
        tc = chw             # full dim -> always a legal lane block dim
    if n <= _SUBLANE:
        tn = n               # full dim -> legal sublane block dim
    else:
        rows = max(_SUBLANE, _TARGET_BLOCK_BYTES // (tc * itemsize))
        tn = min(n, (rows // _SUBLANE) * _SUBLANE)
    return tn, tc


def cifar10_renormalize(x: jax.Array) -> jax.Array:
    """x: (N, 3, H, W), NCHW. Returns (x - mean) / std with CIFAR-10 stats."""
    n, c, h, w = x.shape
    assert c == 3, "Cifar10Renormalize expects 3 input channels (NCHW)"
    hw = h * w
    chw = c * hw

    # Fused constants: y = x * inv_std + bias, bias = -mean * inv_std.
    inv_std = 1.0 / _CIFAR_STD
    scale_c = inv_std.astype(x.dtype)                      # (3,)
    bias_c = (-_CIFAR_MEAN * inv_std).astype(x.dtype)      # (3,)
    # Expand per-channel constants along the flattened (C*H*W) pixel axis so
    # they tile in lock-step with x's lane-dense view.
    scale_row = jnp.repeat(scale_c, hw).reshape(1, chw)    # (1, C*H*W)
    bias_row = jnp.repeat(bias_c, hw).reshape(1, chw)      # (1, C*H*W)

    x2 = x.reshape(n, chw)                                 # free reshape (view)
    tn, tc = _choose_tiles(n, chw, jnp.dtype(x.dtype).itemsize)
    grid = (pl.cdiv(n, tn), pl.cdiv(chw, tc))

    out2 = pl.pallas_call(
        _renorm_kernel,
        out_shape=jax.ShapeDtypeStruct((n, chw), x.dtype),
        grid=grid,
        in_specs=[
            pl.BlockSpec((1, tc), lambda i, j: (0, j)),    # scale row
            pl.BlockSpec((1, tc), lambda i, j: (0, j)),    # bias row
            pl.BlockSpec((tn, tc), lambda i, j: (i, j)),   # x block
        ],
        out_specs=pl.BlockSpec((tn, tc), lambda i, j: (i, j)),
        compiler_params=pltpu.CompilerParams(
            dimension_semantics=("parallel", "parallel"),
        ),
    )(scale_row, bias_row, x2)

    # TODO(synk): `self.wrap` is an arbitrary user-supplied sub-module; treated as
    # identity here since no architecture/weights are specified by the module.
    return out2.reshape(n, c, h, w)


def _reference(x):
    mean = _CIFAR_MEAN.reshape(1, 3, 1, 1).astype(x.dtype)
    std = _CIFAR_STD.reshape(1, 3, 1, 1).astype(x.dtype)
    return (x - mean) / std


if __name__ == "__main__":
    key = jax.random.PRNGKey(0)
    x = jax.random.uniform(key, (2, 3, 16, 16), dtype=jnp.float32)

    y = cifar10_renormalize(x)
    jax.block_until_ready(y)

    y_ref = _reference(x)
    assert y.shape == x.shape and y.dtype == x.dtype
    assert jnp.allclose(y, y_ref, atol=1e-5, rtol=1e-5)

    print("KERNEL_OK")
</pallas_src>

<mosaic_0001>
module attributes {stable_mosaic.version = 11 : i64} {
  func.func @_renorm_kernel(%arg0: i32, %arg1: i32, %arg2: memref<1x768xf32, #tpu.memory_space<vmem>>, %arg3: memref<1x768xf32, #tpu.memory_space<vmem>>, %arg4: memref<2x768xf32, #tpu.memory_space<vmem>>, %arg5: memref<2x768xf32, #tpu.memory_space<vmem>>) attributes {dimension_semantics = [#tpu.dimension_semantics<parallel>, #tpu.dimension_semantics<parallel>], iteration_bounds = array<i64: 1, 1>, scalar_prefetch = 0 : i64, scratch_operands = 0 : i64, tpu.core_type = #tpu.core_type<tc>, window_params = [{transform_indices = @transform_0, window_bounds = array<i64: 1, 768>}, {transform_indices = @transform_1, window_bounds = array<i64: 1, 768>}, {transform_indices = @transform_2, window_bounds = array<i64: 2, 768>}, {transform_indices = @transform_3, window_bounds = array<i64: 2, 768>}]} {
    %c0 = arith.constant 0 : index
    %c0_0 = arith.constant 0 : index
    %0 = vector.load %arg4[%c0, %c0_0] : memref<2x768xf32, #tpu.memory_space<vmem>>, vector<2x768xf32>
    %c0_1 = arith.constant 0 : index
    %c0_2 = arith.constant 0 : index
    %1 = vector.load %arg2[%c0_1, %c0_2] : memref<1x768xf32, #tpu.memory_space<vmem>>, vector<1x768xf32>
    %2 = vector.broadcast %1 : vector<1x768xf32> to vector<2x768xf32>
    %3 = arith.mulf %0, %2 : vector<2x768xf32>
    %c0_3 = arith.constant 0 : index
    %c0_4 = arith.constant 0 : index
    %4 = vector.load %arg3[%c0_3, %c0_4] : memref<1x768xf32, #tpu.memory_space<vmem>>, vector<1x768xf32>
    %5 = vector.broadcast %4 : vector<1x768xf32> to vector<2x768xf32>
    %6 = arith.addf %3, %5 : vector<2x768xf32>
    %c0_5 = arith.constant 0 : index
    %c0_6 = arith.constant 0 : index
    %7 = vector.load %arg5[%c0_5, %c0_6] : memref<2x768xf32, #tpu.memory_space<vmem>>, vector<2x768xf32>
    tpu.vector_store %arg5[%c0_5, %c0_6], %6 {strides = array<i32>} : memref<2x768xf32, #tpu.memory_space<vmem>>, vector<2x768xf32>,
    return
  }
  func.func @transform_0(%arg0: i32, %arg1: i32) -> (i32, i32) {
    %c0_i32 = arith.constant 0 : i32
    %c0_i32_0 = arith.constant 0 : i32
    return %c0_i32, %arg1 : i32, i32
  }
  func.func @transform_1(%arg0: i32, %arg1: i32) -> (i32, i32) {
    %c0_i32 = arith.constant 0 : i32
    %c0_i32_0 = arith.constant 0 : i32
    return %c0_i32, %arg1 : i32, i32
  }
  func.func @transform_2(%arg0: i32, %arg1: i32) -> (i32, i32) {
    %c0_i32 = arith.constant 0 : i32
    return %arg0, %arg1 : i32, i32
  }
  func.func @transform_3(%arg0: i32, %arg1: i32) -> (i32, i32) {
    %c0_i32 = arith.constant 0 : i32
    return %arg0, %arg1 : i32, i32
  }
}

</mosaic_0001>

<bundles_post_ra>
// kernel: tpu_custom_call.1
= control target key start
LH: loop header
LB: loop body
LE: loop exit
PB: predicated region body
PF: predicated region fallthrough
CT: control target
= control target key end

     0   :  { %8 = vsyncpa [#allocation3], 0  ;;  %s352_s0 = inlined_call_operand.hbm [shape: f32[1,768], index: 0, kind: input, shape index: {}]   ;;  %s353_s1 = inlined_call_operand.hbm [shape: f32[1,768], index: 1, kind: input, shape index: {}]   ;;  %s354_s2 = inlined_call_operand.hbm [shape: f32[2,768], index: 2, kind: input, shape index: {}]   ;;  %s355_s3 = inlined_call_operand.hbm [shape: f32[2,768], index: 3, kind: output, shape index: {}]  }
   0x1   :  { %9 = vsyncpa [#allocation6], 0 }
   0x2   :  { %10 = vsyncpa [#allocation4], 0  ;;  %s279_s12 = smov [#allocation5]   ;;  %s280_s14 = smov [#allocation2]  }
   0x3   :  { %s27_s13 = sshll.u32 %s279_s12, 4  ;;  %s17_s15 = sshll.u32 %s280_s14, 4  ;;  %s28_s13 = int_to_ptr.vmem [resolvable:$true] %s27_s13  ;;  %s18_s15 = int_to_ptr.vmem [resolvable:$true] %s17_s15 }
   0x4   :  { %s185_s18 = scalar_lea.hbm %s353_s1, 96 }
   0x5   :  { %p186_p0 = scmp.ne.s32.totalorder %s353_s1, %s185_s18  ;;  %p189_p1 = scmp.lt.u32.totalorder %s185_s18, %s353_s1 }
   0x7   :  { %p191_p2 = pnand %p189_p1, %p186_p0 }
   0x9   :  { %194 = shalt.err (!%p191_p2)
}
   0xa   :  { %s195_s23 = scalar_lea.vmem %s28_s13, 96  ;;  %p200_p4 = scmp.lt.s32.totalorder %s28_s13, %s28_s13 }
   0xb   :  { %p196_p3 = scmp.ne.s32.totalorder %s28_s13, %s195_s23  ;;  %p201_p5 = scmp.lt.s32.totalorder %s195_s23, %s195_s23 }
   0xd   :  { %p202_p6 = por %p201_p5, %p200_p4 }
   0xf   :  { %p203_p7 = pnand %p202_p6, %p196_p3 }
  0x11   :  { %206 = shalt.err (!%p203_p7)
}
  0x12   :  { %30 = dma.hbm_to_vmem [thread:$0]  %s353_s1, 96, %s28_s13, [#allocation6]  }
  0x13   :  { %s207_s28 = scalar_lea.hbm %s352_s0, 96 }
  0x14   :  { %p208_p8 = scmp.ne.s32.totalorder %s352_s0, %s207_s28  ;;  %p211_p9 = scmp.lt.u32.totalorder %s207_s28, %s352_s0 }
  0x16   :  { %p213_p10 = pnand %p211_p9, %p208_p8 }
  0x18   :  { %216 = shalt.err (!%p213_p10)
}
  0x19   :  { %s217_s6 = scalar_lea.vmem %s18_s15, 96  ;;  %p222_p12 = scmp.lt.s32.totalorder %s18_s15, %s18_s15 }
  0x1a   :  { %p218_p11 = scmp.ne.s32.totalorder %s18_s15, %s217_s6  ;;  %p223_p13 = scmp.lt.s32.totalorder %s217_s6, %s217_s6 }
  0x1c   :  { %p224_p0 = por %p223_p13, %p222_p12 }
  0x1e   :  { %p225_p1 = pnand %p224_p0, %p218_p11 }
  0x20   :  { %228 = shalt.err (!%p225_p1)
}
  0x21   :  { %20 = dma.hbm_to_vmem [thread:$0]  %s352_s0, 96, %s18_s15, [#allocation3]  }
  0x22   :  { %s281_s8 = smov [#allocation7]   ;;  %s229_s12 = scalar_lea.hbm %s354_s2, 192 }
  0x23   :  { %s37_s9 = sshll.u32 %s281_s8, 4  ;;  %p230_p2 = scmp.ne.s32.totalorder %s354_s2, %s229_s12  ;;  %s38_s9 = int_to_ptr.vmem [resolvable:$true] %s37_s9 }
  0x24   :  { %p233_p3 = scmp.lt.u32.totalorder %s229_s12, %s354_s2 }
  0x26   :  { %p235_p4 = pnand %p233_p3, %p230_p2 }
  0x28   :  { %238 = shalt.err (!%p235_p4)
}
  0x29   :  { %s239_s18 = scalar_lea.vmem %s38_s9, 192  ;;  %p244_p6 = scmp.lt.s32.totalorder %s38_s9, %s38_s9 }
  0x2a   :  { %p240_p5 = scmp.ne.s32.totalorder %s38_s9, %s239_s18  ;;  %p245_p7 = scmp.lt.s32.totalorder %s239_s18, %s239_s18 }
  0x2c   :  { %p246_p8 = por %p245_p7, %p244_p6 }
  0x2e   :  { %p247_p9 = pnand %p246_p8, %p240_p5 }
  0x30   :  { %250 = shalt.err (!%p247_p9)
}
  0x31   :  { %40 = dma.hbm_to_vmem [thread:$0]  %s354_s2, 192, %s38_s9, [#allocation6]  }
  0x32   :  { %273 = dma.done.wait [#allocation3], 96  }
  0x33   :  { %274 = vsyncadd [#allocation3], 4294967200 }
  0x34   :  { %275 = dma.done.wait [#allocation6], 288  }
  0x35   :  { %276 = vsyncadd [#allocation6], 4294967008  ;;  %v54_v0 = vlaneseq  ;;  %v282_v1 = vmov 1983009808   ;;  %v52_v11 = vld [vmem:[#allocation2] sm:$0x3f] }
  0x36   :  { %v81_v2 = vunpack.c.l.s4 %v282_v1  ;;  %v107_v13 = vld [vmem:[#allocation5] sm:$0x3f]  ;;  %v50_v33 = vld [vmem:[#allocation7] sm:$0xff]  ;;  %v51_v36 = vld [vmem:[#allocation7 + $0x8] sm:$0xf]  ;;  %s283_s2 = smov [#allocation8]  }
  0x37   :  { %v55_v3 = vshrl.u32 %v54_v0, 7  ;;  %s170_s19 = sshll.u32 %s283_s2, 4  ;;  %s171_s19 = int_to_ptr.vmem [resolvable:$true] %s170_s19 }
  0x38   :  { %v82_v4 = vunpack.c.0.s8 %v81_v2  ;;  %s251_s20 = scalar_lea.vmem %s171_s19, 192  ;;  %p256_p11 = scmp.lt.s32.totalorder %s171_s19, %s171_s19 }
  0x39   :  { %v56_v5 = vsub.s32 0, %v55_v3  ;;  %v60_v6 = vsub.s32 1, %v55_v3  ;;  %v64_v7 = vsub.s32 2, %v55_v3  ;;  %v68_v8 = vsub.s32 3, %v55_v3  ;;  %p252_p10 = scmp.ne.s32.totalorder %s171_s19, %s251_s20  ;;  %p257_p12 = scmp.lt.s32.totalorder %s251_s20, %s251_s20 }
  0x3a   :  { %v72_v9 = vsub.s32 4, %v55_v3  ;;  %v76_v10 = vsub.s32 5, %v55_v3  ;;  %v85_v12 = vsub.s32 %v82_v4, %v55_v3 }
  0x3b   :  { %v57_v14 = vrot.slane %v52_v11, %v56_v5  ;;  %v61_v15 = vrot.slane %v52_v11, %v60_v6  ;;  %v65_v16 = vrot.slane %v52_v11, %v64_v7  ;;  %v69_v17 = vrot.slane %v52_v11, %v68_v8  ;;  %p258_p13 = por %p257_p12, %p256_p11 }
  0x3c   :  { %v112_v18 = vrot.slane %v107_v13, %v56_v5  ;;  %v116_v19 = vrot.slane %v107_v13, %v60_v6  ;;  %v120_v20 = vrot.slane %v107_v13, %v64_v7  ;;  %v124_v21 = vrot.slane %v107_v13, %v68_v8 }
  0x3d   :  { %v78_v22 = vcombine.low %v57_v14, %v61_v15  ;;  %v79_v23 = vcombine.low %v65_v16, %v69_v17  ;;  %v73_v24 = vrot.slane %v52_v11, %v72_v9  ;;  %v77_v25 = vrot.slane %v52_v11, %v76_v10  ;;  %p259_p0 = pnand %p258_p13, %p252_p10 }
  0x3e   :  { %v133_v26 = vcombine.low %v112_v18, %v116_v19  ;;  %v134_v27 = vcombine.low %v120_v20, %v124_v21  ;;  %v128_v28 = vrot.slane %v107_v13, %v72_v9  ;;  %v132_v29 = vrot.slane %v107_v13, %v76_v10 }
  0x3f   :  { %v86_v30 = vrot.slane %v78_v22, %v85_v12  ;;  %v93_v31 = vrot.slane %v79_v23, %v85_v12  ;;  %v95_v32 = vcombine.low %v73_v24, %v77_v25 }
  0x40   :  { %v141_v34 = vrot.slane %v133_v26, %v85_v12  ;;  %v148_v35 = vrot.slane %v134_v27, %v85_v12  ;;  %v150_v37 = vcombine.low %v128_v28, %v132_v29 }
  0x41   :  { %v94_v38 = vcombine.low %v86_v30, %v93_v31  ;;  %v102_v39 = vrot.slane %v95_v32, %v85_v12 }
  0x42   :  { %v149_v40 = vcombine.low %v141_v34, %v148_v35  ;;  %v157_v41 = vrot.slane %v150_v37, %v85_v12 }
  0x43   :  { %v105_v42 = vmul.f32 %v94_v38, %v50_v33  ;;  %v106_v43 = vmul.f32 %v102_v39, %v51_v36 }
  0x45   :  { %v160_v44 = vadd.f32 %v149_v40, %v105_v42  ;;  %v161_v45 = vadd.f32 %v157_v41, %v106_v43 }
  0x47   :  { %162 = vst [vmem:[#allocation8] sm:$0xff] %v160_v44  ;;  %163 = vst [vmem:[#allocation8 + $0x8] sm:$0xf] %v161_v45 }
  0x48   :  { %262 = shalt.err (!%p259_p0)
}
  0x49   :  { %s263_s23 = scalar_lea.hbm %s355_s3, 192 }
  0x4a   :  { %p264_p1 = scmp.ne.s32.totalorder %s355_s3, %s263_s23  ;;  %p267_p2 = scmp.lt.u32.totalorder %s263_s23, %s355_s3 }
  0x4c   :  { %p269_p3 = pnand %p267_p2, %p264_p1 }
  0x4e   :  { %272 = shalt.err (!%p269_p3)
}
  0x4f   :  { %173 = dma.vmem_to_hbm [thread:$0]  %s171_s19, 192, %s355_s3, [#allocation4]  }
  0x50   :  { %277 = dma.done.wait [#allocation4], 192  }
  0x51   :  { %278 = vsyncadd [#allocation4], 4294967104 }
  0x52   :  { %177 = vsyncpa [#allocation3], 1 }
  0x53   :  { %178 = vsyncpa [#allocation6], 1 }
  0x54   :  { %179 = vsyncpa [#allocation4], 1 }

</bundles_post_ra>
